<compile_context>
chip_gen: v7x
topology: tpu7x:2x2x1
jax: 0.10.0
libtpu: 0.0.40
codegen_flags: <defaults>
</compile_context>

<pallas_src>
import functools

import jax
import jax.numpy as jnp
from jax.experimental import pallas as pl
from jax.experimental.pallas import tpu as pltpu


def _fs2_l1_kernel(y_ref, x_ref, out_ref, acc_ref, *, inv_n):
    t = pl.program_id(1)

    @pl.when(t == 0)
    def _():
        acc_ref[...] = jnp.zeros_like(acc_ref)

    y = y_ref[...].astype(jnp.float32)
    x = x_ref[...].astype(jnp.float32)
    # (x - (-5)) / (0 - (-5)) * 2 - 1  ==  0.4 * x + 1   (no f32 divide)
    x_norm = x * jnp.float32(0.4) + jnp.float32(1.0)
    acc_ref[...] += jnp.abs(y - x_norm)

    @pl.when(t == pl.num_programs(1) - 1)
    def _():
        # Single cross-lane reduce + scale, once per split.
        out_ref[0, 0] = jnp.sum(acc_ref[...]) * jnp.float32(inv_n)


def _round_up(a, b):
    return ((a + b - 1) // b) * b


def fs2_loss(y, x, *, tile_rows=2048, n_splits=2):
    """Pallas implementation of fs2_loss.forward(y, x) -> scalar L1 loss."""
    assert y.shape == x.shape, "y and x must have identical shapes"
    total = y.size
    lanes = 128

    y_flat = y.reshape(-1)
    x_flat = x.reshape(-1)

    itemsize = jnp.dtype(y_flat.dtype).itemsize
    # Minimum sublane tile: 8 for 32-bit, 16 for 16-bit, 32 for 8-bit dtypes.
    min_sublane = 8 * max(1, 4 // itemsize)

    rows_needed = pl.cdiv(total, lanes)
    tile_rows = min(tile_rows, _round_up(rows_needed, min_sublane))
    tile_rows = _round_up(tile_rows, min_sublane)

    n_tiles_total = pl.cdiv(rows_needed, tile_rows)
    n_splits = max(1, min(n_splits, n_tiles_total))
    tiles_per_split = pl.cdiv(n_tiles_total, n_splits)
    rows_padded = n_splits * tiles_per_split * tile_rows
    padded_total = rows_padded * lanes

    pad = padded_total - total
    if pad > 0:
        # Pad so that y_pad == x_norm_pad (y=1, x=0 -> 0.4*0+1 == 1), hence
        # padded elements contribute exactly zero to the L1 sum.
        y_flat = jnp.pad(y_flat, (0, pad), constant_values=1.0)
        x_flat = jnp.pad(x_flat, (0, pad), constant_values=0.0)

    # Keep native dtype (no wrapper up-cast); widen in-register in the kernel.
    y2 = y_flat.reshape(rows_padded, lanes)
    x2 = x_flat.reshape(rows_padded, lanes)

    def idx_map(s, t):
        return (s * tiles_per_split + t, 0)

    cost = pl.CostEstimate(
        flops=4 * padded_total,
        transcendentals=0,
        bytes_accessed=2 * padded_total * itemsize + 4 * n_splits,
    )

    partials = pl.pallas_call(
        functools.partial(_fs2_l1_kernel, inv_n=1.0 / float(total)),
        out_shape=jax.ShapeDtypeStruct((n_splits, 1), jnp.float32),
        grid_spec=pltpu.PrefetchScalarGridSpec(
            num_scalar_prefetch=0,
            grid=(n_splits, tiles_per_split),
            in_specs=[
                pl.BlockSpec((tile_rows, lanes), idx_map),
                pl.BlockSpec((tile_rows, lanes), idx_map),
            ],
            out_specs=pl.BlockSpec(
                (1, 1), lambda s, t: (s, 0), memory_space=pltpu.SMEM
            ),
            scratch_shapes=[pltpu.VMEM((tile_rows, lanes), jnp.float32)],
        ),
        compiler_params=pltpu.CompilerParams(
            dimension_semantics=("parallel", "arbitrary"),
        ),
        cost_estimate=cost,
    )(y2, x2)

    # Per-split partials already carry the 1/N factor; sum them.
    return jnp.sum(partials)


if __name__ == "__main__":
    key = jax.random.PRNGKey(0)
    ky, kx = jax.random.split(key)

    # Small shapes consistent with the module's elementwise/reduction forward:
    # y is a prediction in roughly [-1, 1], x is an un-normalized target in [-5, 0].
    shape = (2, 4, 16, 16)  # NCHW; 2048 elements
    y = jax.random.uniform(ky, shape, jnp.float32, minval=-1.0, maxval=1.0)
    x = jax.random.uniform(kx, shape, jnp.float32, minval=-5.0, maxval=0.0)

    loss = fs2_loss(y, x)
    loss = jax.block_until_ready(loss)

    # Pure-JAX reference check (literal formula from the PyTorch module).
    x_norm = (x + 5.0) / 5.0 * 2.0 - 1.0
    ref = jnp.mean(jnp.abs(y - x_norm))
    assert jnp.allclose(loss, ref, rtol=1e-5, atol=1e-6), (loss, ref)

    print("KERNEL_OK")
</pallas_src>

<mosaic_0001>
module attributes {stable_mosaic.version = 11 : i64} {
  func.func @_fs2_l1_kernel(%arg0: i32, %arg1: i32, %arg2: memref<16x128xf32, #tpu.memory_space<vmem>>, %arg3: memref<16x128xf32, #tpu.memory_space<vmem>>, %arg4: memref<1x1xf32, #tpu.memory_space<smem>>, %arg5: memref<16x128xf32, #tpu.memory_space<vmem>>) attributes {dimension_semantics = [#tpu.dimension_semantics<parallel>, #tpu.dimension_semantics<arbitrary>], iteration_bounds = array<i64: 1, 1>, scalar_prefetch = 0 : i64, scratch_operands = 1 : i64, tpu.core_type = #tpu.core_type<tc>, window_params = [{transform_indices = @transform_0, window_bounds = array<i64: 16, 128>}, {transform_indices = @transform_1, window_bounds = array<i64: 16, 128>}, {transform_indices = @transform_2, window_bounds = array<i64: 1, 1>}]} {
    %c0_i32 = arith.constant 0 : i32
    %0 = arith.cmpi eq, %arg1, %c0_i32 : i32
    %1 = arith.extui %0 : i1 to i32
    %c0_i32_0 = arith.constant 0 : i32
    %2 = arith.cmpi ne, %1, %c0_i32_0 : i32
    scf.if %2 {
      %cst_11 = arith.constant 0.000000e+00 : f32
      %17 = vector.broadcast %cst_11 : f32 to vector<16x128xf32>
      %c0_12 = arith.constant 0 : index
      %c0_13 = arith.constant 0 : index
      %18 = vector.load %arg5[%c0_12, %c0_13] : memref<16x128xf32, #tpu.memory_space<vmem>>, vector<16x128xf32>
      tpu.vector_store %arg5[%c0_12, %c0_13], %17 {strides = array<i32>} : memref<16x128xf32, #tpu.memory_space<vmem>>, vector<16x128xf32>,
    } else {
    }
    %c0 = arith.constant 0 : index
    %c0_1 = arith.constant 0 : index
    %3 = vector.load %arg2[%c0, %c0_1] : memref<16x128xf32, #tpu.memory_space<vmem>>, vector<16x128xf32>
    %c0_2 = arith.constant 0 : index
    %c0_3 = arith.constant 0 : index
    %4 = vector.load %arg3[%c0_2, %c0_3] : memref<16x128xf32, #tpu.memory_space<vmem>>, vector<16x128xf32>
    %cst = arith.constant 4.000000e-01 : f32
    %5 = vector.broadcast %cst : f32 to vector<16x128xf32>
    %6 = arith.mulf %4, %5 : vector<16x128xf32>
    %cst_4 = arith.constant 1.000000e+00 : f32
    %7 = vector.broadcast %cst_4 : f32 to vector<16x128xf32>
    %8 = arith.addf %6, %7 : vector<16x128xf32>
    %c0_5 = arith.constant 0 : index
    %c0_6 = arith.constant 0 : index
    %9 = vector.load %arg5[%c0_5, %c0_6] : memref<16x128xf32, #tpu.memory_space<vmem>>, vector<16x128xf32>
    %10 = arith.subf %3, %8 : vector<16x128xf32>
    %11 = math.absf %10 : vector<16x128xf32>
    %12 = arith.addf %9, %11 : vector<16x128xf32>
    %c0_7 = arith.constant 0 : index
    %c0_8 = arith.constant 0 : index
    %13 = vector.load %arg5[%c0_7, %c0_8] : memref<16x128xf32, #tpu.memory_space<vmem>>, vector<16x128xf32>
    tpu.vector_store %arg5[%c0_7, %c0_8], %12 {strides = array<i32>} : memref<16x128xf32, #tpu.memory_space<vmem>>, vector<16x128xf32>,
    %c0_i32_9 = arith.constant 0 : i32
    %14 = arith.cmpi eq, %arg1, %c0_i32_9 : i32
    %15 = arith.extui %14 : i1 to i32
    %c0_i32_10 = arith.constant 0 : i32
    %16 = arith.cmpi ne, %15, %c0_i32_10 : i32
    scf.if %16 {
      %c0_11 = arith.constant 0 : index
      %c0_12 = arith.constant 0 : index
      %17 = vector.load %arg5[%c0_11, %c0_12] : memref<16x128xf32, #tpu.memory_space<vmem>>, vector<16x128xf32>
      %18 = vector.shape_cast %17 : vector<16x128xf32> to vector<1x16x128xf32>
      %cst_13 = arith.constant dense<0.000000e+00> : vector<1xf32>
      %19 = vector.multi_reduction <add>, %18, %cst_13 [1, 2] : vector<1x16x128xf32> to vector<1xf32>
      %20 = vector.shape_cast %19 : vector<1xf32> to vector<1x1x1xf32>
      %21 = vector.extract %20[0, 0, 0] : f32 from vector<1x1x1xf32>
      %cst_14 = arith.constant 4.8828125E-4 : f32
      %22 = arith.mulf %21, %cst_14 : f32
      %c0_15 = arith.constant 0 : index
      %c0_16 = arith.constant 0 : index
      %23 = memref.load %arg4[%c0_15, %c0_16] : memref<1x1xf32, #tpu.memory_space<smem>>
      memref.store %22, %arg4[%c0_15, %c0_16] : memref<1x1xf32, #tpu.memory_space<smem>>
    } else {
    }
    return
  }
  func.func @transform_0(%arg0: i32, %arg1: i32) -> (i32, i32) {
    %c1_i32 = arith.constant 1 : i32
    %0 = arith.muli %arg0, %c1_i32 : i32
    %1 = arith.addi %0, %arg1 : i32
    %c0_i32 = arith.constant 0 : i32
    %c0_i32_0 = arith.constant 0 : i32
    return %1, %c0_i32 : i32, i32
  }
  func.func @transform_1(%arg0: i32, %arg1: i32) -> (i32, i32) {
    %c1_i32 = arith.constant 1 : i32
    %0 = arith.muli %arg0, %c1_i32 : i32
    %1 = arith.addi %0, %arg1 : i32
    %c0_i32 = arith.constant 0 : i32
    %c0_i32_0 = arith.constant 0 : i32
    return %1, %c0_i32 : i32, i32
  }
  func.func @transform_2(%arg0: i32, %arg1: i32) -> (i32, i32) {
    %c0_i32 = arith.constant 0 : i32
    %c0_i32_0 = arith.constant 0 : i32
    return %arg0, %c0_i32 : i32, i32
  }
}

</mosaic_0001>

<bundles_post_ra>
// kernel: tpu_custom_call.1
= control target key start
LH: loop header
LB: loop body
LE: loop exit
PB: predicated region body
PF: predicated region fallthrough
CT: control target
= control target key end

     0   :  { %7 = vsyncpa [#allocation4], 0  ;;  %s232_s0 = inlined_call_operand.hbm [shape: f32[16,128], index: 0, kind: input, shape index: {}]   ;;  %s233_s1 = inlined_call_operand.hbm [shape: f32[16,128], index: 1, kind: input, shape index: {}]   ;;  %s234_s2 = inlined_call_operand.hbm [shape: f32[1,1], index: 2, kind: output, shape index: {}]  }
   0x1   :  { %8 = vsyncpa [#allocation7], 0 }
   0x2   :  { %9 = vsyncpa [#allocation5], 0  ;;  %s176_s9 = smov [#allocation3]   ;;  %s116_s13 = scalar_lea.hbm %s232_s0, 256 }
   0x3   :  { %s19_s10 = sshll.u32 %s176_s9, 4  ;;  %p117_p0 = scmp.ne.s32.totalorder %s232_s0, %s116_s13  ;;  %s20_s10 = int_to_ptr.vmem [resolvable:$true] %s19_s10 }
   0x4   :  { %p120_p1 = scmp.lt.u32.totalorder %s116_s13, %s232_s0 }
   0x6   :  { %p122_p2 = pnand %p120_p1, %p117_p0 }
   0x8   :  { %125 = shalt.err (!%p122_p2)
}
   0x9   :  { %s126_s18 = scalar_lea.vmem %s20_s10, 256  ;;  %p131_p4 = scmp.lt.s32.totalorder %s20_s10, %s20_s10 }
   0xa   :  { %p127_p3 = scmp.ne.s32.totalorder %s20_s10, %s126_s18  ;;  %p132_p5 = scmp.lt.s32.totalorder %s126_s18, %s126_s18 }
   0xc   :  { %p133_p6 = por %p132_p5, %p131_p4 }
   0xe   :  { %p134_p7 = pnand %p133_p6, %p127_p3 }
  0x10   :  { %137 = shalt.err (!%p134_p7)
}
  0x11   :  { %s177_s19 = smov 128   ;;  %s178_s20 = smov 8  }
  0x12   :  { %25 = dma.hbm_to_vmem [thread:$0]  %s232_s0, 256, %s20_s10, [#allocation4], %s177_s19, %s177_s19, %s178_s20  }
  0x13   :  { %s179_s23 = smov [#allocation6]   ;;  %s138_s27 = scalar_lea.hbm %s233_s1, 256 }
  0x14   :  { %s35_s24 = sshll.u32 %s179_s23, 4  ;;  %p139_p8 = scmp.ne.s32.totalorder %s233_s1, %s138_s27  ;;  %s36_s24 = int_to_ptr.vmem [resolvable:$true] %s35_s24 }
  0x15   :  { %p142_p9 = scmp.lt.u32.totalorder %s138_s27, %s233_s1 }
  0x17   :  { %p144_p10 = pnand %p142_p9, %p139_p8 }
  0x19   :  { %147 = shalt.err (!%p144_p10)
}
  0x1a   :  { %s148_s4 = scalar_lea.vmem %s36_s24, 256  ;;  %p153_p12 = scmp.lt.s32.totalorder %s36_s24, %s36_s24 }
  0x1b   :  { %p149_p11 = scmp.ne.s32.totalorder %s36_s24, %s148_s4  ;;  %p154_p13 = scmp.lt.s32.totalorder %s148_s4, %s148_s4 }
  0x1d   :  { %p155_p0 = por %p154_p13, %p153_p12 }
  0x1f   :  { %p156_p1 = pnand %p155_p0, %p149_p11 }
  0x21   :  { %159 = shalt.err (!%p156_p1)
}
  0x22   :  { %41 = dma.hbm_to_vmem [thread:$0]  %s233_s1, 256, %s36_s24, [#allocation7], %s177_s19, %s177_s19, %s178_s20  }
  0x23   :  { %170 = dma.done.wait [#allocation4], 256  }
  0x24   :  { %171 = vsyncadd [#allocation4], 4294967040 }
  0x25   :  { %172 = dma.done.wait [#allocation7], 256  }
  0x26   :  { %173 = vsyncadd [#allocation7], 4294967040  ;;  %v60_v0 = vld [vmem:[#allocation6] sm:$0xff]  ;;  %v61_v1 = vld [vmem:[#allocation6 + $0x8] sm:$0xff]  ;;  %s160_s9 = scalar_lea.hbm %s234_s2, 16 }
  0x27   :  { %v62_v2 = vmul.f32 0.4, %v60_v0  ;;  %v58_v3 = vld [vmem:[#allocation3] sm:$0xff]  ;;  %v63_v4 = vmul.f32 0.4, %v61_v1  ;;  %v59_v5 = vld [vmem:[#allocation3 + $0x8] sm:$0xff]  ;;  %p161_p2 = scmp.ne.s32.totalorder %s234_s2, %s160_s9  ;;  %p164_p3 = scmp.lt.u32.totalorder %s160_s9, %s234_s2 }
  0x29   :  { %v64_v6 = vadd.f32 1.0, %v62_v2  ;;  %v65_v7 = vadd.f32 1.0, %v63_v4  ;;  %p166_p4 = pnand %p164_p3, %p161_p2 }
  0x2b   :  { %v68_v8 = vsub.f32 %v58_v3, %v64_v6  ;;  %v69_v9 = vsub.f32 %v59_v5, %v65_v7 }
  0x2d   :  { %v70_v10 = vand.u32 2147483647, %v68_v8  ;;  %v71_v11 = vand.u32 2147483647, %v69_v9 }
  0x2f   :  { %v81_v12 = vadd.f32 %v71_v11, %v70_v10 }
  0x31   :  { %82 = vadd.xlane.f32.xlu0 %v81_v12 }
  0xbe   :  { %v83_v13 = vpop.xlane.xlu0 %82 }
  0xbf   :  { %v84_v14 = vrot.slane %v83_v13, 4 }
  0xc1   :  { %v85_v15 = vadd.f32 %v84_v14, %v83_v13 }
  0xc3   :  { %v86_v16 = vrot.slane %v85_v15, 2 }
  0xc5   :  { %v87_v17 = vadd.f32 %v86_v16, %v85_v15 }
  0xc7   :  { %v88_v18 = vrot.slane %v87_v17, 1 }
  0xc9   :  { %v89_v19 = vadd.f32 %v88_v18, %v87_v17 }
  0xcb   :  { %109 = vpush %v89_v19 }
  0xfc   :  { %s110_s1 = spop %109 }
  0xfd   :  { %s91_s6 = smul.f32 0.00048828125, %s110_s1 }
  0xff   :  { %93 = sst [smem:[#allocation8]] %s91_s6 }
 0x100   :  { %169 = shalt.err (!%p166_p4)
}
 0x101   :  { %s180_s14 = smov [#allocation8]  }
 0x102   :  { %101 = dma.smem_to_hbm %s180_s14, 16, %s234_s2, [#allocation5]  }
 0x103   :  { %174 = dma.done.wait [#allocation5], 16  }
 0x104   :  { %175 = vsyncadd [#allocation5], 4294967280 }
 0x105   :  { %105 = sfence }
 0x106   :  { %106 = vsyncpa [#allocation4], 1 }
 0x107   :  { %107 = vsyncpa [#allocation7], 1 }
 0x108   :  { %108 = vsyncpa [#allocation5], 1 }

</bundles_post_ra>
